<compile_context>
chip_gen: v7x
topology: tpu7x:2x2x1
jax: 0.10.0
libtpu: 0.0.40
codegen_flags: <defaults>
</compile_context>

<pallas_src>
import jax
import jax.numpy as jnp
from jax.experimental import pallas as pl
from jax.experimental.pallas import tpu as pltpu

# Model dimensions (hidden_size1 = 2048 comes from the PyTorch script; the
# CSV-derived input_size / num_classes are picked as small synthetic values).
BATCH = 8
INPUT_SIZE = 32
HIDDEN1 = 2048
NUM_CLASSES = 10

LANE = 128  # pad the class dimension up to a lane-dense multiple of 128


def mlp_kernel(x_ref, w1_ref, b1_ref, w2_ref, b2_ref, o_ref):
    """Single-shot fused MLP: fc1 -> ReLU -> fc4 (everything resident in VMEM)."""
    # fc1: (B, F) @ (F, H), bf16 operands on the MXU, f32 accumulation.
    h = jnp.dot(x_ref[...], w1_ref[...], preferred_element_type=jnp.float32)
    # Bias + ReLU in f32 on the VPU.
    h = jnp.maximum(h + b1_ref[...], 0.0)
    # fc4: (B, H) @ (H, C_pad), bf16 operands, f32 accumulation.
    o = jnp.dot(h.astype(jnp.bfloat16), w2_ref[...],
                preferred_element_type=jnp.float32)
    o_ref[...] = (o + b2_ref[...]).astype(o_ref.dtype)


def neural_net_forward(x, w1, b1, w2, b2):
    """x: (B, F) f32; w1: (F, H); b1: (H,); w2: (H, C); b2: (C,). Returns (B, C) f32."""
    B, F = x.shape
    H = w1.shape[1]
    C = w2.shape[1]
    C_pad = ((C + LANE - 1) // LANE) * LANE  # 10 -> 128: lane-dense output/N-dim

    # Wrapper-side dtype / padding prep.
    x_bf = x.astype(jnp.bfloat16)
    w1_bf = w1.astype(jnp.bfloat16)
    b1_2d = b1.reshape(1, H).astype(jnp.float32)
    w2_pad = jnp.pad(w2, ((0, 0), (0, C_pad - C))).astype(jnp.bfloat16)
    b2_2d = jnp.pad(b2, (0, C_pad - C)).reshape(1, C_pad).astype(jnp.float32)

    out_padded = pl.pallas_call(
        mlp_kernel,
        out_shape=jax.ShapeDtypeStruct((B, C_pad), jnp.float32),
        grid_spec=pltpu.PrefetchScalarGridSpec(
            num_scalar_prefetch=0,
            grid=(1,),
            in_specs=[
                pl.BlockSpec((B, F), lambda i: (0, 0)),        # x (whole, bf16)
                pl.BlockSpec((F, H), lambda i: (0, 0)),        # fc1 weight (whole, bf16)
                pl.BlockSpec((1, H), lambda i: (0, 0)),        # fc1 bias (f32)
                pl.BlockSpec((H, C_pad), lambda i: (0, 0)),    # fc4 weight (padded, bf16)
                pl.BlockSpec((1, C_pad), lambda i: (0, 0)),    # fc4 bias (padded, f32)
            ],
            out_specs=pl.BlockSpec((B, C_pad), lambda i: (0, 0)),
        ),
        compiler_params=pltpu.CompilerParams(
            dimension_semantics=("arbitrary",),
        ),
    )(x_bf, w1_bf, b1_2d, w2_pad, b2_2d)

    # Slice the padded class dimension back to the true number of classes.
    return out_padded[:, :C]


def init_params(key):
    """Deterministic init mimicking nn.Linear's U(-1/sqrt(fan_in), 1/sqrt(fan_in))."""
    k1, k2, k3, k4 = jax.random.split(key, 4)
    bound1 = 1.0 / jnp.sqrt(INPUT_SIZE)
    bound2 = 1.0 / jnp.sqrt(HIDDEN1)
    w1 = jax.random.uniform(k1, (INPUT_SIZE, HIDDEN1), jnp.float32, -bound1, bound1)
    b1 = jax.random.uniform(k2, (HIDDEN1,), jnp.float32, -bound1, bound1)
    w2 = jax.random.uniform(k3, (HIDDEN1, NUM_CLASSES), jnp.float32, -bound2, bound2)
    b2 = jax.random.uniform(k4, (NUM_CLASSES,), jnp.float32, -bound2, bound2)
    return w1, b1, w2, b2


def reference_forward(x, w1, b1, w2, b2):
    h = jnp.maximum(x @ w1 + b1, 0.0)
    return h @ w2 + b2


if __name__ == "__main__":
    key = jax.random.PRNGKey(0)
    kx, kp = jax.random.split(key)
    x = jax.random.normal(kx, (BATCH, INPUT_SIZE), jnp.float32)
    w1, b1, w2, b2 = init_params(kp)

    out = neural_net_forward(x, w1, b1, w2, b2)
    out = jax.block_until_ready(out)

    ref = reference_forward(x, w1, b1, w2, b2)
    assert out.shape == (BATCH, NUM_CLASSES)
    # bf16 weights/activations on the MXU (f32 accumulation) -> loosened tolerance.
    assert jnp.allclose(out, ref, atol=2e-2, rtol=2e-2)

    print("KERNEL_OK")
</pallas_src>

<mosaic_0001>
module attributes {stable_mosaic.version = 11 : i64} {
  func.func @mlp_kernel(%arg0: i32, %arg1: memref<8x32xbf16, #tpu.memory_space<vmem>>, %arg2: memref<32x2048xbf16, #tpu.memory_space<vmem>>, %arg3: memref<1x2048xf32, #tpu.memory_space<vmem>>, %arg4: memref<2048x128xbf16, #tpu.memory_space<vmem>>, %arg5: memref<1x128xf32, #tpu.memory_space<vmem>>, %arg6: memref<8x128xf32, #tpu.memory_space<vmem>>) attributes {dimension_semantics = [#tpu.dimension_semantics<arbitrary>], iteration_bounds = array<i64: 1>, scalar_prefetch = 0 : i64, scratch_operands = 0 : i64, tpu.core_type = #tpu.core_type<tc>, window_params = [{pipeline_mode = #tpu.pipeline_mode<synchronous>, transform_indices = @transform_0, window_bounds = array<i64: 8, 32>}, {pipeline_mode = #tpu.pipeline_mode<synchronous>, transform_indices = @transform_1, window_bounds = array<i64: 32, 2048>}, {pipeline_mode = #tpu.pipeline_mode<synchronous>, transform_indices = @transform_2, window_bounds = array<i64: 1, 2048>}, {pipeline_mode = #tpu.pipeline_mode<synchronous>, transform_indices = @transform_3, window_bounds = array<i64: 2048, 128>}, {pipeline_mode = #tpu.pipeline_mode<synchronous>, transform_indices = @transform_4, window_bounds = array<i64: 1, 128>}, {pipeline_mode = #tpu.pipeline_mode<synchronous>, transform_indices = @transform_5, window_bounds = array<i64: 8, 128>}]} {
    %c0 = arith.constant 0 : index
    %c0_0 = arith.constant 0 : index
    %0 = vector.load %arg1[%c0, %c0_0] : memref<8x32xbf16, #tpu.memory_space<vmem>>, vector<8x32xbf16>
    %c0_1 = arith.constant 0 : index
    %c0_2 = arith.constant 0 : index
    %1 = vector.load %arg2[%c0_1, %c0_2] : memref<32x2048xbf16, #tpu.memory_space<vmem>>, vector<32x2048xbf16>
    %cst = arith.constant dense<0.000000e+00> : vector<8x2048xf32>
    %2 = tpu.matmul %0, %1, %cst {dimension_numbers = #tpu.dot_dimension_numbers<[1], [0], [0], [1], [0, 0, 1, 1], [], []>} : vector<8x32xbf16>, vector<32x2048xbf16>, vector<8x2048xf32> -> vector<8x2048xf32>
    %c0_3 = arith.constant 0 : index
    %c0_4 = arith.constant 0 : index
    %3 = vector.load %arg3[%c0_3, %c0_4] : memref<1x2048xf32, #tpu.memory_space<vmem>>, vector<1x2048xf32>
    %4 = vector.broadcast %3 : vector<1x2048xf32> to vector<8x2048xf32>
    %5 = arith.addf %2, %4 : vector<8x2048xf32>
    %cst_5 = arith.constant 0.000000e+00 : f32
    %6 = vector.broadcast %cst_5 : f32 to vector<8x2048xf32>
    %7 = arith.maximumf %5, %6 : vector<8x2048xf32>
    %8 = arith.truncf %7 : vector<8x2048xf32> to vector<8x2048xbf16>
    %c0_6 = arith.constant 0 : index
    %c0_7 = arith.constant 0 : index
    %9 = vector.load %arg4[%c0_6, %c0_7] : memref<2048x128xbf16, #tpu.memory_space<vmem>>, vector<2048x128xbf16>
    %cst_8 = arith.constant dense<0.000000e+00> : vector<8x128xf32>
    %10 = tpu.matmul %8, %9, %cst_8 {dimension_numbers = #tpu.dot_dimension_numbers<[1], [0], [0], [1], [0, 0, 1, 1], [], []>} : vector<8x2048xbf16>, vector<2048x128xbf16>, vector<8x128xf32> -> vector<8x128xf32>
    %c0_9 = arith.constant 0 : index
    %c0_10 = arith.constant 0 : index
    %11 = vector.load %arg5[%c0_9, %c0_10] : memref<1x128xf32, #tpu.memory_space<vmem>>, vector<1x128xf32>
    %12 = vector.broadcast %11 : vector<1x128xf32> to vector<8x128xf32>
    %13 = arith.addf %10, %12 : vector<8x128xf32>
    %c0_11 = arith.constant 0 : index
    %c0_12 = arith.constant 0 : index
    %14 = vector.load %arg6[%c0_11, %c0_12] : memref<8x128xf32, #tpu.memory_space<vmem>>, vector<8x128xf32>
    tpu.vector_store %arg6[%c0_11, %c0_12], %13 {strides = array<i32>} : memref<8x128xf32, #tpu.memory_space<vmem>>, vector<8x128xf32>,
    return
  }
  func.func @transform_0(%arg0: i32) -> (i32, i32) {
    %c0_i32 = arith.constant 0 : i32
    %c0_i32_0 = arith.constant 0 : i32
    %c0_i32_1 = arith.constant 0 : i32
    return %c0_i32, %c0_i32_0 : i32, i32
  }
  func.func @transform_1(%arg0: i32) -> (i32, i32) {
    %c0_i32 = arith.constant 0 : i32
    %c0_i32_0 = arith.constant 0 : i32
    %c0_i32_1 = arith.constant 0 : i32
    return %c0_i32, %c0_i32_0 : i32, i32
  }
  func.func @transform_2(%arg0: i32) -> (i32, i32) {
    %c0_i32 = arith.constant 0 : i32
    %c0_i32_0 = arith.constant 0 : i32
    %c0_i32_1 = arith.constant 0 : i32
    return %c0_i32, %c0_i32_0 : i32, i32
  }
  func.func @transform_3(%arg0: i32) -> (i32, i32) {
    %c0_i32 = arith.constant 0 : i32
    %c0_i32_0 = arith.constant 0 : i32
    %c0_i32_1 = arith.constant 0 : i32
    return %c0_i32, %c0_i32_0 : i32, i32
  }
  func.func @transform_4(%arg0: i32) -> (i32, i32) {
    %c0_i32 = arith.constant 0 : i32
    %c0_i32_0 = arith.constant 0 : i32
    %c0_i32_1 = arith.constant 0 : i32
    return %c0_i32, %c0_i32_0 : i32, i32
  }
  func.func @transform_5(%arg0: i32) -> (i32, i32) {
    %c0_i32 = arith.constant 0 : i32
    %c0_i32_0 = arith.constant 0 : i32
    %c0_i32_1 = arith.constant 0 : i32
    return %c0_i32, %c0_i32_0 : i32, i32
  }
}

</mosaic_0001>

<bundles_post_ra>
// kernel: tpu_custom_call.1
= control target key start
LH: loop header
LB: loop body
LE: loop exit
PB: predicated region body
PF: predicated region fallthrough
CT: control target
= control target key end

     0   :  { %10 = vsyncpa [#allocation3], 0  ;;  %s2888_s0 = inlined_call_operand.hbm [shape: bf16[8,32], index: 0, kind: input, shape index: {}]   ;;  %s2889_s1 = inlined_call_operand.hbm [shape: bf16[32,2048], index: 1, kind: input, shape index: {}]   ;;  %s2890_s2 = inlined_call_operand.hbm [shape: f32[1,2048], index: 2, kind: input, shape index: {}]   ;;  %s2891_s3 = inlined_call_operand.hbm [shape: bf16[2048,128], index: 3, kind: input, shape index: {}]   ;;  %s2892_s4 = inlined_call_operand.vmem [shape: f32[1,128], index: 4, kind: input, shape index: {}]   ;;  %s2893_s5 = inlined_call_operand.hbm [shape: f32[8,128], index: 5, kind: output, shape index: {}]  }
   0x1   :  { %11 = vsyncpa [#allocation6], 0 }
   0x2   :  { %12 = vsyncpa [#allocation9], 0 }
   0x3   :  { %13 = vsyncpa [#allocation4], 0  ;;  %s2683_s18 = smov [#allocation5]   ;;  %s2565_s22 = scalar_lea.hbm %s2889_s1, 4096 }
   0x4   :  { %s29_s19 = sshll.u32 %s2683_s18, 4  ;;  %p2566_p0 = scmp.ne.s32.totalorder %s2889_s1, %s2565_s22  ;;  %s30_s19 = int_to_ptr.vmem [resolvable:$true] %s29_s19 }
   0x5   :  { %p2569_p1 = scmp.lt.u32.totalorder %s2565_s22, %s2889_s1 }
   0x7   :  { %p2571_p2 = pnand %p2569_p1, %p2566_p0 }
   0x9   :  { %2574 = shalt.err (!%p2571_p2)
}
   0xa   :  { %s2575_s27 = scalar_lea.vmem %s30_s19, 4096  ;;  %p2580_p4 = scmp.lt.s32.totalorder %s30_s19, %s30_s19 }
   0xb   :  { %p2576_p3 = scmp.ne.s32.totalorder %s30_s19, %s2575_s27  ;;  %p2581_p5 = scmp.lt.s32.totalorder %s2575_s27, %s2575_s27 }
   0xd   :  { %p2582_p6 = por %p2581_p5, %p2580_p4 }
   0xf   :  { %p2583_p7 = pnand %p2582_p6, %p2576_p3 }
  0x11   :  { %2586 = shalt.err (!%p2583_p7)
}
  0x12   :  { %s2684_s28 = smov 1024   ;;  %s2685_s29 = smov 64  }
  0x13   :  { %35 = dma.hbm_to_vmem [thread:$0]  %s2889_s1, 4096, %s30_s19, [#allocation6], %s2684_s28, %s2684_s28, %s2685_s29  }
  0x14   :  { %s2686_s7 = smov [#allocation2]   ;;  %s2687_s9 = smov [#allocation7]  }
  0x15   :  { %s20_s8 = sshll.u32 %s2686_s7, 4  ;;  %s42_s10 = sshll.u32 %s2687_s9, 4  ;;  %s21_s8 = int_to_ptr.vmem [resolvable:$true] %s20_s8  ;;  %s43_s10 = int_to_ptr.vmem [resolvable:$true] %s42_s10 }
  0x16   :  { %s2587_s13 = scalar_lea.hbm %s2888_s0, 64 }
  0x17   :  { %p2588_p8 = scmp.ne.s32.totalorder %s2888_s0, %s2587_s13  ;;  %p2591_p9 = scmp.lt.u32.totalorder %s2587_s13, %s2888_s0 }
  0x19   :  { %p2593_p10 = pnand %p2591_p9, %p2588_p8 }
  0x1b   :  { %2596 = shalt.err (!%p2593_p10)
}
  0x1c   :  { %s2597_s1 = scalar_lea.vmem %s21_s8, 64  ;;  %p2602_p12 = scmp.lt.s32.totalorder %s21_s8, %s21_s8 }
  0x1d   :  { %p2598_p11 = scmp.ne.s32.totalorder %s21_s8, %s2597_s1  ;;  %p2603_p13 = scmp.lt.s32.totalorder %s2597_s1, %s2597_s1 }
  0x1f   :  { %p2604_p0 = por %p2603_p13, %p2602_p12 }
  0x21   :  { %p2605_p1 = pnand %p2604_p0, %p2598_p11 }
  0x23   :  { %2608 = shalt.err (!%p2605_p1)
}
  0x24   :  { %23 = dma.hbm_to_vmem [thread:$0]  %s2888_s0, 64, %s21_s8, [#allocation3]  }
  0x25   :  { %s2609_s22 = scalar_lea.hbm %s2890_s2, 256 }
  0x26   :  { %p2610_p2 = scmp.ne.s32.totalorder %s2890_s2, %s2609_s22  ;;  %p2613_p3 = scmp.lt.u32.totalorder %s2609_s22, %s2890_s2 }
  0x28   :  { %p2615_p4 = pnand %p2613_p3, %p2610_p2 }
  0x2a   :  { %2618 = shalt.err (!%p2615_p4)
}
  0x2b   :  { %s2619_s27 = scalar_lea.vmem %s43_s10, 256  ;;  %p2624_p6 = scmp.lt.s32.totalorder %s43_s10, %s43_s10 }
  0x2c   :  { %p2620_p5 = scmp.ne.s32.totalorder %s43_s10, %s2619_s27  ;;  %p2625_p7 = scmp.lt.s32.totalorder %s2619_s27, %s2619_s27 }
  0x2e   :  { %p2626_p8 = por %p2625_p7, %p2624_p6 }
  0x30   :  { %p2627_p9 = pnand %p2626_p8, %p2620_p5 }
  0x32   :  { %2630 = shalt.err (!%p2627_p9)
}
  0x33   :  { %45 = dma.hbm_to_vmem [thread:$0]  %s2890_s2, 256, %s43_s10, [#allocation6]  }
  0x34   :  { %s2688_s30 = smov [#allocation8]   ;;  %s2631_s9 = scalar_lea.hbm %s2891_s3, 16384 }
  0x35   :  { %s51_s6 = sshll.u32 %s2688_s30, 4  ;;  %p2632_p10 = scmp.ne.s32.totalorder %s2891_s3, %s2631_s9  ;;  %s52_s6 = int_to_ptr.vmem [resolvable:$true] %s51_s6 }
  0x36   :  { %p2635_p11 = scmp.lt.u32.totalorder %s2631_s9, %s2891_s3 }
  0x38   :  { %p2637_p12 = pnand %p2635_p11, %p2632_p10 }
  0x3a   :  { %2640 = shalt.err (!%p2637_p12)
}
  0x3b   :  { %s2641_s15 = scalar_lea.vmem %s52_s6, 16384  ;;  %p2646_p0 = scmp.lt.s32.totalorder %s52_s6, %s52_s6 }
  0x3c   :  { %p2642_p13 = scmp.ne.s32.totalorder %s52_s6, %s2641_s15  ;;  %p2647_p1 = scmp.lt.s32.totalorder %s2641_s15, %s2641_s15 }
  0x3e   :  { %p2648_p2 = por %p2647_p1, %p2646_p0 }
  0x40   :  { %p2649_p3 = pnand %p2648_p2, %p2642_p13 }
  0x42   :  { %2652 = shalt.err (!%p2649_p3)
}
  0x43   :  { %s2689_s2 = smov 4  }
  0x44   :  { %57 = dma.hbm_to_vmem [thread:$0]  %s2891_s3, 16384, %s52_s6, [#allocation9], %s2685_s29, %s2685_s29, %s2689_s2  }
  0x45   :  { %2675 = dma.done.wait [#allocation3], 64  }
  0x46   :  { %2676 = vsyncadd [#allocation3], 4294967232 }
  0x47   :  { %2677 = dma.done.wait [#allocation6], 4352  }
  0x48   :  { %2678 = vsyncadd [#allocation6], 4294962944 }
  0x49   :  { %2679 = dma.done.wait [#allocation9], 16384  }
  0x4a   :  { %2680 = vsyncadd [#allocation9], 4294950912  ;;  %v2690_v0 = vmov 0   ;;  %v74_v1 = vld [vmem:[#allocation5] sm:$0xff]  ;;  %v75_v3 = vld [vmem:[#allocation5 + $0x8] sm:$0xff]  ;;  %vm350_vm0 = vcmask 261120  }
  0x4b   :  { %386 = vmatprep.mubr.bf16.mxu0 %v2690_v0  ;;  %427 = vmatprep.mubr.bf16.mxu1 %v2690_v0  ;;  %v82_v2 = vld [vmem:[#allocation5 + $0x40] sm:$0xff]  ;;  %v83_v5 = vld [vmem:[#allocation5 + $0x48] sm:$0xff]  ;;  %v76_v15 = vld [vmem:[#allocation5 + $0x10] sm:$0xff] }
  0x4c   :  { %v2084_v4 = vcombine.high %v74_v1, %v82_v2  ;;  %v2083_v6 = vcombine.low %v74_v1, %v82_v2  ;;  %v90_v7 = vld [vmem:[#allocation5 + $0x80] sm:$0xff]  ;;  %v2086_v9 = vcombine.high %v75_v3, %v83_v5  ;;  %v2085_v10 = vcombine.low %v75_v3, %v83_v5  ;;  %v91_v12 = vld [vmem:[#allocation5 + $0x88] sm:$0xff]  ;;  %v84_v16 = vld [vmem:[#allocation5 + $0x50] sm:$0xff] }
  0x4d   :  { %v98_v8 = vld [vmem:[#allocation5 + $0xc0] sm:$0xff]  ;;  %v99_v13 = vld [vmem:[#allocation5 + $0xc8] sm:$0xff]  ;;  %v77_v17 = vld [vmem:[#allocation5 + $0x18] sm:$0xff]  ;;  %v2088_v21 = vcombine.high %v76_v15, %v84_v16  ;;  %v2087_v28 = vcombine.low %v76_v15, %v84_v16 }
  0x4e   :  { %v2100_v11 = vcombine.high %v90_v7, %v98_v8  ;;  %354 = vmatprep.subr.bf16.mxu0 %v2084_v4  ;;  %v2102_v14 = vcombine.high %v91_v12, %v99_v13  ;;  %395 = vmatprep.subr.bf16.mxu1 %v2086_v9  ;;  %v2099_v18 = vcombine.low %v90_v7, %v98_v8  ;;  %v85_v19 = vld [vmem:[#allocation5 + $0x58] sm:$0xff]  ;;  %v92_v23 = vld [vmem:[#allocation5 + $0x90] sm:$0xff]  ;;  %v78_v32 = vld [vmem:[#allocation5 + $0x20] sm:$0xff] }
  0x4f   :  { %355 = vmatpush1.bf16.msra.mxu0 %v2083_v6  ;;  %396 = vmatpush1.bf16.msra.mxu1 %v2085_v10  ;;  %v2101_v20 = vcombine.low %v91_v12, %v99_v13  ;;  %v2090_v22 = vcombine.high %v77_v17, %v85_v19  ;;  %v100_v24 = vld [vmem:[#allocation5 + $0xd0] sm:$0xff]  ;;  %v93_v25 = vld [vmem:[#allocation5 + $0x98] sm:$0xff]  ;;  %v2089_v29 = vcombine.low %v77_v17, %v85_v19  ;;  %v86_v33 = vld [vmem:[#allocation5 + $0x60] sm:$0xff] }
  0x50   :  { %356 = vmatprep.subr.bf16.mxu0 %v2100_v11  ;;  %397 = vmatprep.subr.bf16.mxu1 %v2102_v14  ;;  %v101_v26 = vld [vmem:[#allocation5 + $0xd8] sm:$0xff]  ;;  %v2104_v30 = vcombine.high %v92_v23, %v100_v24  ;;  %v79_v34 = vld [vmem:[#allocation5 + $0x28] sm:$0xff]  ;;  %v2103_v36 = vcombine.low %v92_v23, %v100_v24  ;;  %v94_v37 = vld [vmem:[#allocation5 + $0xa0] sm:$0xff]  ;;  %v2092_v39 = vcombine.high %v78_v32, %v86_v33 }
  0x51   :  { %v2775_v27 = vld [vmem:[#allocation2] sm:$0xf]  ;;  %v2106_v31 = vcombine.high %v93_v25, %v101_v26  ;;  %v87_v35 = vld [vmem:[#allocation5 + $0x68] sm:$0xff]  ;;  %v2105_v38 = vcombine.low %v93_v25, %v101_v26  ;;  %v102_v40 = vld [vmem:[#allocation5 + $0xe0] sm:$0xff]  ;;  %v2091_v44 = vcombine.low %v78_v32, %v86_v33 }
  0x52   :  { %v2094_v41 = vcombine.high %v79_v34, %v87_v35  ;;  %v95_v42 = vld [vmem:[#allocation5 + $0xa8] sm:$0xff]  ;;  %v80_v45 = vld [vmem:[#allocation5 + $0x30] sm:$0xff]  ;;  %v2093_v46 = vcombine.low %v79_v34, %v87_v35  ;;  %v2108_v47 = vcombine.high %v94_v37, %v102_v40  ;;  %v81_v50 = vld [vmem:[#allocation5 + $0x38] sm:$0xff]  ;;  %v2107_v52 = vcombine.low %v94_v37, %v102_v40 }
  0x53   :  { %357 = vmatpush1.bf16.msra.mxu0 %v2099_v18  ;;  %398 = vmatpush1.bf16.msra.mxu1 %v2101_v20  ;;  %v103_v43 = vld [vmem:[#allocation5 + $0xe8] sm:$0xff]  ;;  %v88_v48 = vld [vmem:[#allocation5 + $0x70] sm:$0xff]  ;;  %v89_v51 = vld [vmem:[#allocation5 + $0x78] sm:$0xff] }
  0x54   :  { %436 = vmatprep.subr.bf16.mxu0 %v2088_v21  ;;  %477 = vmatprep.subr.bf16.mxu1 %v2090_v22  ;;  %v2110_v49 = vcombine.high %v95_v42, %v103_v43  ;;  %v96_v53 = vld [vmem:[#allocation5 + $0xb0] sm:$0xff]  ;;  %v2109_v54 = vcombine.low %v95_v42, %v103_v43  ;;  %v2096_v55 = vcombine.high %v80_v45, %v88_v48  ;;  %v97_v58 = vld [vmem:[#allocation5 + $0xb8] sm:$0xff]  ;;  %v2445_v11 = vld [vmem:[#allocation8 + $0x50] sm:$0xff]  }
  0x55   :  { %v104_v56 = vld [vmem:[#allocation5 + $0xf0] sm:$0xff]  ;;  %v2098_v57 = vcombine.high %v81_v50, %v89_v51  ;;  %v105_v59 = vld [vmem:[#allocation5 + $0xf8] sm:$0xff]  ;;  %v2095_v60 = vcombine.low %v80_v45, %v88_v48  ;;  %v2097_v61 = vcombine.low %v81_v50, %v89_v51  ;;  %v2446_v12 = vld [vmem:[#allocation8 + $0xd0] sm:$0xff]  }
  0x56   :  { %2115 = vmatmul.mubr.msk.bf16.vlgmr.msra.gmra.mrb[0].mxu0 %vm350_vm0, %v2775_v27  ;;  %2116 = vmatmul.mubr.msk.bf16.vlgmr.msra.gmra.mrb[0].mxu1 %vm350_vm0, %v2775_v27  ;;  %v2112_v62 = vcombine.high %v96_v53, %v104_v56  ;;  %v2114_v63 = vcombine.high %v97_v58, %v105_v59  ;;  %v2111_v1 = vcombine.low %v96_v53, %v104_v56  ;;  %v2437_v2 = vld [vmem:[#allocation8 + $0x40] sm:$0xff]   ;;  %v2441_v7 = vld [vmem:[#allocation8 + $0x48] sm:$0xff]   ;;  %v2448_v13 = vld [vmem:[#allocation8 + $0x90] sm:$0xff]  }
  0x57   :  { %437 = vmatpush1.bf16.msra.mxu0 %v2087_v28  ;;  %478 = vmatpush1.bf16.msra.mxu1 %v2089_v29  ;;  %v2113_v3 = vcombine.low %v97_v58, %v105_v59  ;;  %v2438_v4 = vld [vmem:[#allocation8 + $0xc0] sm:$0xff]   ;;  %v2442_v8 = vld [vmem:[#allocation8 + $0xc8] sm:$0xff]   ;;  %v2449_v14 = vld [vmem:[#allocation8 + $0x58] sm:$0xff]  }
  0x58   :  { %438 = vmatprep.subr.bf16.mxu0 %v2104_v30  ;;  %479 = vmatprep.subr.bf16.mxu1 %v2106_v31  ;;  %v2439_v5 = vld [vmem:[#allocation8] sm:$0xff]   ;;  %v2443_v9 = vld [vmem:[#allocation8 + $0x8] sm:$0xff]   ;;  %v2450_v15 = vld [vmem:[#allocation8 + $0xd8] sm:$0xff]  }
  0x59   :  { %468 = vmatprep.mubr.bf16.mxu0 %v2690_v0  ;;  %509 = vmatprep.mubr.bf16.mxu1 %v2690_v0  ;;  %v2440_v6 = vld [vmem:[#allocation8 + $0x80] sm:$0xff]   ;;  %v2444_v10 = vld [vmem:[#allocation8 + $0x88] sm:$0xff]   ;;  %v2451_v16 = vld [vmem:[#allocation8 + $0x18] sm:$0xff]  }
  0x5a   :  { %v2452_v17 = vld [vmem:[#allocation8 + $0x98] sm:$0xff]   ;;  %v2453_v18 = vld [vmem:[#allocation8 + $0x60] sm:$0xff]   ;;  %v2457_v22 = vld [vmem:[#allocation8 + $0x68] sm:$0xff]  }
  0x5b   :  { %439 = vmatpush1.bf16.msra.mxu0 %v2103_v36  ;;  %480 = vmatpush1.bf16.msra.mxu1 %v2105_v38  ;;  %v2454_v19 = vld [vmem:[#allocation8 + $0xe0] sm:$0xff]   ;;  %v2458_v23 = vld [vmem:[#allocation8 + $0xe8] sm:$0xff]   ;;  %v2461_v26 = vld [vmem:[#allocation8 + $0x70] sm:$0xff]   ;;  %v110_v36 = vlaneseq }
  0x5c   :  { %518 = vmatprep.subr.bf16.mxu0 %v2092_v39  ;;  %559 = vmatprep.subr.bf16.mxu1 %v2094_v41  ;;  %v2455_v20 = vld [vmem:[#allocation8 + $0x20] sm:$0xff]   ;;  %v2459_v24 = vld [vmem:[#allocation8 + $0x28] sm:$0xff]   ;;  %v2463_v28 = vld [vmem:[#allocation8 + $0x30] sm:$0xff]  }
  0x5d   :  { %v2456_v21 = vld [vmem:[#allocation8 + $0xa0] sm:$0xff]   ;;  %v2460_v25 = vld [vmem:[#allocation8 + $0xa8] sm:$0xff]   ;;  %v2464_v29 = vld [vmem:[#allocation8 + $0xb0] sm:$0xff]   ;;  %v2799_v37 = vshrl.u32 %v110_v36, 7 }
  0x5e   :  { %2117 = vmatmul.mubr.msk.bf16.vlgmr.msra.gmra.mrb[4].mxu0 %vm350_vm0, %v2775_v27  ;;  %2118 = vmatmul.mubr.msk.bf16.vlgmr.msra.gmra.mrb[4].mxu1 %vm350_vm0, %v2775_v27  ;;  %v2465_v30 = vld [vmem:[#allocation8 + $0x78] sm:$0xff]   ;;  %v2469_v34 = vld [vmem:[#allocation8 + $0x140] sm:$0xff]   ;;  %v2802_v39 = vld [vmem:[#allocation7] sm:$0xff] }
  0x5f   :  { %519 = vmatpush1.bf16.msra.mxu0 %v2091_v44  ;;  %560 = vmatpush1.bf16.msra.mxu1 %v2093_v46  ;;  %v2466_v31 = vld [vmem:[#allocation8 + $0xf8] sm:$0xff]   ;;  %v2470_v35 = vld [vmem:[#allocation8 + $0x1c0] sm:$0xff]   ;;  %v112_v38 = vsub.s32 0, %v2799_v37  ;;  %v120_v40 = vsub.s32 2, %v2799_v37  ;;  %v116_v41 = vsub.s32 1, %v2799_v37  ;;  %v124_v42 = vsub.s32 3, %v2799_v37 }
  0x60   :  { %520 = vmatprep.subr.bf16.mxu0 %v2108_v47  ;;  %561 = vmatprep.subr.bf16.mxu1 %v2110_v49  ;;  %v2467_v32 = vld [vmem:[#allocation8 + $0x38] sm:$0xff]  }
  0x61   :  { %550 = vmatprep.mubr.bf16.mxu0 %v2690_v0  ;;  %591 = vmatprep.mubr.bf16.mxu1 %v2690_v0  ;;  %v2468_v33 = vld [vmem:[#allocation8 + $0xb8] sm:$0xff]   ;;  %v113_v43 = vrot.slane %v2802_v39, %v112_v38  ;;  %v121_v44 = vrot.slane %v2802_v39, %v120_v40  ;;  %v117_v45 = vrot.slane %v2802_v39, %v116_v41 }
  0x62   :  { %v125_v46 = vrot.slane %v2802_v39, %v124_v42 }
  0x63   :  { %521 = vmatpush1.bf16.msra.mxu0 %v2107_v52  ;;  %562 = vmatpush1.bf16.msra.mxu1 %v2109_v54 }
  0x64   :  { %600 = vmatprep.subr.bf16.mxu0 %v2096_v55  ;;  %641 = vmatprep.subr.bf16.mxu1 %v2098_v57  ;;  %v132_v55 = vsub.s32 5, %v2799_v37 }
  0x66   :  { %2119 = vmatmul.mubr.msk.bf16.vlgmr.msra.gmra.mrb[8].mxu0 %vm350_vm0, %v2775_v27  ;;  %2120 = vmatmul.mubr.msk.bf16.vlgmr.msra.gmra.mrb[8].mxu1 %vm350_vm0, %v2775_v27 }
  0x67   :  { %601 = vmatpush1.bf16.msra.mxu0 %v2095_v60  ;;  %642 = vmatpush1.bf16.msra.mxu1 %v2097_v61  ;;  %v140_v60 = vsub.s32 7, %v2799_v37 }
  0x68   :  { %602 = vmatprep.subr.bf16.mxu0 %v2112_v62  ;;  %643 = vmatprep.subr.bf16.mxu1 %v2114_v63 }
  0x69   :  { %632 = vmatprep.mubr.bf16.mxu0 %v2690_v0  ;;  %673 = vmatprep.mubr.bf16.mxu1 %v2690_v0  ;;  %v2447_v0 = vld [vmem:[#allocation8 + $0x10] sm:$0xff]  }
  0x6b   :  { %603 = vmatpush1.bf16.msra.mxu0 %v2111_v1  ;;  %644 = vmatpush1.bf16.msra.mxu1 %v2113_v3 }
  0x6c   :  { %2252 = vmatprep.subr.bf16.mxu0 %v2437_v2  ;;  %2274 = vmatprep.subr.bf16.mxu1 %v2438_v4  ;;  %v2471_v4 = vld [vmem:[#allocation8 + $0x100] sm:$0xff]  }
  0x6e   :  { %2121 = vmatmul.mubr.msk.bf16.vlgmr.msra.gmra.mrb[12].mxu0 %vm350_vm0, %v2775_v27  ;;  %2122 = vmatmul.mubr.msk.bf16.vlgmr.msra.gmra.mrb[12].mxu1 %vm350_vm0, %v2775_v27  ;;  %v2462_v27 = vld [vmem:[#allocation8 + $0xf0] sm:$0xff]  }
  0x6f   :  { %2253 = vmatpush3.bf16.msra.mxu0 %v2439_v5  ;;  %2275 = vmatpush3.bf16.msra.mxu1 %v2440_v6  ;;  %v133_v5 = vrot.slane %v2802_v39, %v132_v55 }
  0x70   :  { %2254 = vmatprep.subr.bf16.mxu0 %v2441_v7  ;;  %2276 = vmatprep.subr.bf16.mxu1 %v2442_v8  ;;  %v2472_v8 = vld [vmem:[#allocation8 + $0x180] sm:$0xff]  }
  0x73   :  { %2255 = vmatpush3.bf16.msra.mxu0 %v2443_v9  ;;  %2277 = vmatpush3.bf16.msra.mxu1 %v2444_v10  ;;  %v2473_v9 = vld [vmem:[#allocation8 + $0x148] sm:$0xff]   ;;  %v141_v10 = vrot.slane %v2802_v39, %v140_v60 }
  0x74   :  { %2256 = vmatprep.subr.bf16.mxu0 %v2445_v11  ;;  %2278 = vmatprep.subr.bf16.mxu1 %v2446_v12  ;;  %v2474_v11 = vld [vmem:[#allocation8 + $0x1c8] sm:$0xff]  }
  0x77   :  { %2257 = vmatpush3.bf16.msra.mxu0 %v2447_v0  ;;  %2279 = vmatpush3.bf16.msra.mxu1 %v2448_v13 }
  0x78   :  { %2258 = vmatprep.subr.bf16.mxu0 %v2449_v14  ;;  %2280 = vmatprep.subr.bf16.mxu1 %v2450_v15  ;;  %v2475_v14 = vld [vmem:[#allocation8 + $0x108] sm:$0xff]  }
  0x7b   :  { %2259 = vmatpush3.bf16.msra.mxu0 %v2451_v16  ;;  %2281 = vmatpush3.bf16.msra.mxu1 %v2452_v17 }
  0x7c   :  { %2260 = vmatprep.subr.bf16.mxu0 %v2453_v18  ;;  %2282 = vmatprep.subr.bf16.mxu1 %v2454_v19  ;;  %v2829_v18 = vld [vmem:[#allocation7 + $0x8] sm:$0xff]  ;;  %v2476_v19 = vld [vmem:[#allocation8 + $0x188] sm:$0xff]  }
  0x7f   :  { %2261 = vmatpush3.bf16.msra.mxu0 %v2455_v20  ;;  %2283 = vmatpush3.bf16.msra.mxu1 %v2456_v21  ;;  %v2477_v20 = vld [vmem:[#allocation8 + $0x150] sm:$0xff]  }
  0x80   :  { %2262 = vmatprep.subr.bf16.mxu0 %v2457_v22  ;;  %2284 = vmatprep.subr.bf16.mxu1 %v2458_v23 }
  0x83   :  { %2263 = vmatpush3.bf16.msra.mxu0 %v2459_v24  ;;  %2285 = vmatpush3.bf16.msra.mxu1 %v2460_v25  ;;  %v2478_v24 = vld [vmem:[#allocation8 + $0x1d0] sm:$0xff]  }
  0x84   :  { %2264 = vmatprep.subr.bf16.mxu0 %v2461_v26  ;;  %2286 = vmatprep.subr.bf16.mxu1 %v2462_v27 }
  0x87   :  { %2265 = vmatpush3.bf16.msra.mxu0 %v2463_v28  ;;  %2287 = vmatpush3.bf16.msra.mxu1 %v2464_v29  ;;  %v145_v28 = vrot.slane %v2829_v18, %v112_v38  ;;  %v2479_v29 = vld [vmem:[#allocation8 + $0x110] sm:$0xff]  }
  0x88   :  { %2266 = vmatprep.subr.bf16.mxu0 %v2465_v30  ;;  %2288 = vmatprep.subr.bf16.mxu1 %v2466_v31  ;;  %v153_v31 = vrot.slane %v2829_v18, %v120_v40 }
  0x8b   :  { %2267 = vmatpush3.bf16.msra.mxu0 %v2467_v32  ;;  %2289 = vmatpush3.bf16.msra.mxu1 %v2468_v33  ;;  %v2480_v32 = vld [vmem:[#allocation8 + $0x190] sm:$0xff]   ;;  %v2481_v33 = vld [vmem:[#allocation8 + $0x158] sm:$0xff]  }
  0x8c   :  { %2296 = vmatprep.subr.bf16.mxu0 %v2469_v34  ;;  %2318 = vmatprep.subr.bf16.mxu1 %v2470_v35  ;;  %v2482_v35 = vld [vmem:[#allocation8 + $0x1d8] sm:$0xff]  }
 0x129   :  { %v388_v47 = vpop.f32.mrb[0].mxu0  ;;  %v429_v49 = vpop.f32.mrb[0].mxu1 }
 0x12a   :  { %v389_v48 = vadd.f32 %v388_v47, %v113_v43  ;;  %v390_v50 = vpop.f32.mrb[1].mxu0  ;;  %v430_v51 = vadd.f32 %v429_v49, %v121_v44  ;;  %v431_v53 = vpop.f32.mrb[1].mxu1  ;;  %v2485_v49 = vld [vmem:[#allocation8 + $0x160] sm:$0xff]  }
 0x12b   :  { %v391_v52 = vadd.f32 %v390_v50, %v117_v45  ;;  %v392_v54 = vpop.f32.mrb[2].mxu0  ;;  %v432_v57 = vadd.f32 %v431_v53, %v125_v46  ;;  %v433_v58 = vpop.f32.mrb[2].mxu1  ;;  %v2483_v45 = vld [vmem:[#allocation8 + $0x118] sm:$0xff]   ;;  %v128_v50 = vsub.s32 4, %v2799_v37  ;;  %v2486_v53 = vld [vmem:[#allocation8 + $0x1e0] sm:$0xff]  }
 0x12c   :  { %v682_v56 = vmax.f32 %v389_v48, 0.0  ;;  %v393_v59 = vpop.f32.mrb[3].mxu0  ;;  %v684_v61 = vmax.f32 %v430_v51, 0.0  ;;  %v434_v63 = vpop.f32.mrb[3].mxu1  ;;  %v2484_v48 = vld [vmem:[#allocation8 + $0x198] sm:$0xff]   ;;  %v136_v54 = vsub.s32 6, %v2799_v37 }
 0x12d   :  { %v683_v62 = vmax.f32 %v391_v52, 0.0  ;;  %v685_v1 = vmax.f32 %v432_v57, 0.0  ;;  %v161_v57 = vrot.slane %v2829_v18, %v128_v50  ;;  %v2487_v58 = vld [vmem:[#allocation8 + $0x120] sm:$0xff]   ;;  %v2490_v63 = vld [vmem:[#allocation8 + $0x1e8] sm:$0xff]   ;;  %v2531_v37 = vld [vmem:[#allocation8 + $0x238] sm:$0xff]  }
 0x12e   :  { %v700_v2 = vpack.c.bf16 %v684_v61, %v684_v61  ;;  %v698_v6 = vpack.c.bf16 %v682_v56, %v682_v56  ;;  %v169_v59 = vrot.slane %v2829_v18, %v136_v54  ;;  %v2488_v61 = vld [vmem:[#allocation8 + $0x1a0] sm:$0xff]  }
 0x12f   :  { %v699_v3 = vpack.c.bf16 %v683_v62, %v683_v62  ;;  %v701_v7 = vpack.c.bf16 %v685_v1, %v685_v1  ;;  %v2489_v62 = vld [vmem:[#allocation8 + $0x168] sm:$0xff]  }
 0x131   :  { %1777 = vmatprep.mubr.bf16.mxu0 %v699_v3  ;;  %v2825_v12 = vpop.f32.mrb[4].mxu0  ;;  %1817 = vmatprep.mubr.bf16.mxu1 %v701_v7  ;;  %v2827_v13 = vpop.f32.mrb[4].mxu1  ;;  %v137_v7 = vrot.slane %v2802_v39, %v136_v54  ;;  %v2515_v54 = vld [vmem:[#allocation8 + $0x218] sm:$0xff]  }
 0x132   :  { %1778 = vmatmul.mubr.bf16.vlgmr.msra.gmra.mrb[16].mxu0 %v698_v6  ;;  %v472_v0 = vpop.f32.mrb[5].mxu0  ;;  %1818 = vmatmul.mubr.bf16.vlgmr.msra.gmra.mrb[16].mxu1 %v700_v2  ;;  %v513_v17 = vpop.f32.mrb[5].mxu1  ;;  %v129_v2 = vrot.slane %v2802_v39, %v128_v50  ;;  %v2491_v6 = vld [vmem:[#allocation8 + $0x128] sm:$0xff]   ;;  %v2511_v50 = vld [vmem:[#allocation8 + $0x210] sm:$0xff]  }
 0x133   :  { %2297 = vmatpush3.bf16.msra.mxu0 %v2471_v4  ;;  %v473_v15 = vadd.f32 %v472_v0, %v133_v5  ;;  %v474_v16 = vpop.f32.mrb[6].mxu0  ;;  %2319 = vmatpush3.bf16.msra.mxu1 %v2472_v8  ;;  %v514_v22 = vadd.f32 %v513_v17, %v141_v10  ;;  %v515_v23 = vpop.f32.mrb[6].mxu1  ;;  %v2493_v0 = vld [vmem:[#allocation8 + $0x170] sm:$0xff]   ;;  %v149_v17 = vrot.slane %v2829_v18, %v116_v41 }
 0x134   :  { %2298 = vmatprep.subr.bf16.mxu0 %v2473_v9  ;;  %v475_v21 = vpop.f32.mrb[7].mxu0  ;;  %2320 = vmatprep.subr.bf16.mxu1 %v2474_v11  ;;  %v516_v26 = vpop.f32.mrb[7].mxu1  ;;  %v2492_v11 = vld [vmem:[#allocation8 + $0x1a8] sm:$0xff]   ;;  %v2494_v16 = vld [vmem:[#allocation8 + $0x1f0] sm:$0xff]   ;;  %v471_v39 = vadd.f32 %v2825_v12, %v129_v2  ;;  %v2499_v12 = vld [vmem:[#allocation8 + $0x138] sm:$0xff]  }
 0x135   :  { %v687_v25 = vmax.f32 %v473_v15, 0.0  ;;  %v689_v27 = vmax.f32 %v514_v22, 0.0  ;;  %v512_v21 = vadd.f32 %v2827_v13, %v137_v7  ;;  %v2495_v22 = vld [vmem:[#allocation8 + $0x130] sm:$0xff]   ;;  %v2524_v2 = vld [vmem:[#allocation8 + $0x2a8] sm:$0xff]   ;;  %v165_v7 = vrot.slane %v2829_v18, %v132_v55 }
 0x136   :  { %v2496_v23 = vld [vmem:[#allocation8 + $0x1b0] sm:$0xff]  }
 0x137   :  { %2299 = vmatpush3.bf16.msra.mxu0 %v2475_v14  ;;  %v703_v30 = vpack.c.bf16 %v687_v25, %v687_v25  ;;  %2321 = vmatpush3.bf16.msra.mxu1 %v2476_v19  ;;  %v705_v34 = vpack.c.bf16 %v689_v27, %v689_v27  ;;  %v2498_v25 = vld [vmem:[#allocation8 + $0x1f8] sm:$0xff]   ;;  %v686_v27 = vmax.f32 %v471_v39, 0.0  ;;  %v2534_v39 = vld [vmem:[#allocation8 + $0x3c0] sm:$0xff]  }
 0x138   :  { %2300 = vmatprep.subr.bf16.mxu0 %v2477_v20  ;;  %2322 = vmatprep.subr.bf16.mxu1 %v2478_v24  ;;  %v157_v20 = vrot.slane %v2829_v18, %v124_v42  ;;  %v2497_v24 = vld [vmem:[#allocation8 + $0x178] sm:$0xff]   ;;  %v2501_v42 = vld [vmem:[#allocation8 + $0x240] sm:$0xff]  }
 0x139   :  { %1857 = vmatprep.mubr.bf16.mxu0 %v703_v30  ;;  %v552_v36 = vpop.f32.mrb[8].mxu0  ;;  %1897 = vmatprep.mubr.bf16.mxu1 %v705_v34  ;;  %v593_v44 = vpop.f32.mrb[8].mxu1  ;;  %v2502_v30 = vld [vmem:[#allocation8 + $0x2c0] sm:$0xff]  }
 0x13a   :  { %v2835_v43 = vadd.f32 %v552_v36, %v145_v28  ;;  %v554_v38 = vpop.f32.mrb[9].mxu0  ;;  %v2837_v47 = vadd.f32 %v593_v44, %v153_v31  ;;  %v595_v40 = vpop.f32.mrb[9].mxu1  ;;  %v688_v28 = vmax.f32 %v512_v21, 0.0  ;;  %v702_v31 = vpack.c.bf16 %v686_v27, %v686_v27  ;;  %v2503_v34 = vld [vmem:[#allocation8 + $0x200] sm:$0xff]   ;;  %v2505_v36 = vld [vmem:[#allocation8 + $0x248] sm:$0xff]  }
 0x13b   :  { %2301 = vmatpush3.bf16.msra.mxu0 %v2479_v29  ;;  %v556_v46 = vpop.f32.mrb[10].mxu0  ;;  %2323 = vmatpush3.bf16.msra.mxu1 %v2480_v32  ;;  %v597_v52 = vpop.f32.mrb[10].mxu1  ;;  %v555_v26 = vadd.f32 %v554_v38, %v149_v17  ;;  %v596_v41 = vadd.f32 %v595_v40, %v157_v20  ;;  %v2500_v29 = vld [vmem:[#allocation8 + $0x1b8] sm:$0xff]   ;;  %v2506_v38 = vld [vmem:[#allocation8 + $0x2c8] sm:$0xff]  }
 0x13c   :  { %2302 = vmatprep.subr.bf16.mxu0 %v2481_v33  ;;  %v557_v51 = vpop.f32.mrb[11].mxu0  ;;  %2324 = vmatprep.subr.bf16.mxu1 %v2482_v35  ;;  %v598_v56 = vpop.f32.mrb[11].mxu1  ;;  %v704_v33 = vpack.c.bf16 %v688_v28, %v688_v28  ;;  %v2504_v35 = vld [vmem:[#allocation8 + $0x280] sm:$0xff]   ;;  %v2507_v46 = vld [vmem:[#allocation8 + $0x208] sm:$0xff]   ;;  %v2513_v52 = vld [vmem:[#allocation8 + $0x258] sm:$0xff]   ;;  %v690_v17 = vmax.f32 %v2835_v43, 0.0 }
 0x13d   :  { %v691_v13 = vmax.f32 %v555_v26, 0.0  ;;  %v693_v32 = vmax.f32 %v596_v41, 0.0  ;;  %v2508_v40 = vld [vmem:[#allocation8 + $0x288] sm:$0xff]   ;;  %v2512_v51 = vld [vmem:[#allocation8 + $0x290] sm:$0xff]   ;;  %v2516_v56 = vld [vmem:[#allocation8 + $0x298] sm:$0xff]   ;;  %v692_v55 = vmax.f32 %v2837_v47, 0.0 }
 0x13e   :  { %v706_v21 = vpack.c.bf16 %v690_v17, %v690_v17  ;;  %v2536_v43 = vld [vmem:[#allocation8 + $0x380] sm:$0xff]   ;;  %v2538_v47 = vld [vmem:[#allocation8 + $0x3c8] sm:$0xff]   ;;  %v2541_v41 = vld [vmem:[#allocation8 + $0x350] sm:$0xff]  }
 0x13f   :  { %2303 = vmatpush3.bf16.msra.mxu0 %v2483_v45  ;;  %2325 = vmatpush3.bf16.msra.mxu1 %v2484_v48  ;;  %v707_v44 = vpack.c.bf16 %v691_v13, %v691_v13  ;;  %v709_v45 = vpack.c.bf16 %v693_v32, %v693_v32  ;;  %v2509_v48 = vld [vmem:[#allocation8 + $0x250] sm:$0xff]   ;;  %v2539_v26 = vld [vmem:[#allocation8 + $0x308] sm:$0xff]   ;;  %v2547_v13 = vld [vmem:[#allocation8 + $0x318] sm:$0xff]  }
 0x140   :  { %2304 = vmatprep.subr.bf16.mxu0 %v2485_v49  ;;  %2326 = vmatprep.subr.bf16.mxu1 %v2486_v53  ;;  %v2510_v49 = vld [vmem:[#allocation8 + $0x2d0] sm:$0xff]   ;;  %v2514_v53 = vld [vmem:[#allocation8 + $0x2d8] sm:$0xff]   ;;  %v2540_v27 = vld [vmem:[#allocation8 + $0x388] sm:$0xff]  }
 0x141   :  { %v634_v1 = vpop.f32.mrb[12].mxu0  ;;  %v675_v5 = vpop.f32.mrb[12].mxu1  ;;  %v2542_v28 = vld [vmem:[#allocation8 + $0x3d0] sm:$0xff]   ;;  %v2549_v32 = vld [vmem:[#allocation8 + $0x360] sm:$0xff]  }
 0x142   :  { %v2844_v3 = vadd.f32 %v634_v1, %v161_v57  ;;  %v2846_v4 = vpop.f32.mrb[13].mxu0  ;;  %v2849_v9 = vadd.f32 %v675_v5, %v169_v59  ;;  %v2851_v10 = vpop.f32.mrb[13].mxu1  ;;  %v2517_v57 = vld [vmem:[#allocation8 + $0x260] sm:$0xff]   ;;  %v2523_v1 = vld [vmem:[#allocation8 + $0x228] sm:$0xff]   ;;  %v2525_v5 = vld [vmem:[#allocation8 + $0x270] sm:$0xff]  }
 0x143   :  { %2305 = vmatpush3.bf16.msra.mxu0 %v2487_v58  ;;  %v638_v8 = vpop.f32.mrb[14].mxu0  ;;  %2327 = vmatpush3.bf16.msra.mxu1 %v2488_v61  ;;  %v679_v15 = vpop.f32.mrb[14].mxu1  ;;  %v2518_v58 = vld [vmem:[#allocation8 + $0x2e0] sm:$0xff]  }
 0x144   :  { %2306 = vmatprep.subr.bf16.mxu0 %v2489_v62  ;;  %v639_v14 = vpop.f32.mrb[15].mxu0  ;;  %2328 = vmatprep.subr.bf16.mxu1 %v2490_v63  ;;  %v680_v19 = vpop.f32.mrb[15].mxu1  ;;  %v2519_v59 = vld [vmem:[#allocation8 + $0x220] sm:$0xff]   ;;  %v2521_v62 = vld [vmem:[#allocation8 + $0x268] sm:$0xff]   ;;  %v173_v8 = vrot.slane %v2829_v18, %v140_v60  ;;  %v2530_v15 = vld [vmem:[#allocation8 + $0x2f8] sm:$0xff]  }
 0x145   :  { %v2520_v61 = vld [vmem:[#allocation8 + $0x2a0] sm:$0xff]   ;;  %v2522_v63 = vld [vmem:[#allocation8 + $0x2e8] sm:$0xff]   ;;  %v2529_v14 = vld [vmem:[#allocation8 + $0x278] sm:$0xff]  }
 0x146   :  { %v678_v19 = vadd.f32 %v2851_v10, %v173_v8  ;;  %v2532_v60 = vld [vmem:[#allocation8 + $0x2b8] sm:$0xff]   ;;  %v2533_v18 = vld [vmem:[#allocation8 + $0x340] sm:$0xff]   ;;  %v2537_v10 = vld [vmem:[#allocation8 + $0x348] sm:$0xff]  }
 0x147   :  { %2307 = vmatpush3.bf16.msra.mxu0 %v2491_v6  ;;  %2329 = vmatpush3.bf16.msra.mxu1 %v2492_v11  ;;  %v2526_v6 = vld [vmem:[#allocation8 + $0x2f0] sm:$0xff]  }
 0x148   :  { %2308 = vmatprep.subr.bf16.mxu0 %v2493_v0  ;;  %2330 = vmatprep.subr.bf16.mxu1 %v2494_v16  ;;  %v2527_v11 = vld [vmem:[#allocation8 + $0x230] sm:$0xff]   ;;  %v637_v16 = vadd.f32 %v2846_v4, %v165_v7  ;;  %v2535_v4 = vld [vmem:[#allocation8 + $0x300] sm:$0xff]  }
 0x149   :  { %v2528_v0 = vld [vmem:[#allocation8 + $0x2b0] sm:$0xff]  }
 0x14a   :  { %v695_v20 = vmax.f32 %v637_v16, 0.0 }
 0x14b   :  { %2309 = vmatpush3.bf16.msra.mxu0 %v2495_v22  ;;  %2331 = vmatpush3.bf16.msra.mxu1 %v2496_v23  ;;  %v697_v22 = vmax.f32 %v678_v19, 0.0  ;;  %v708_v23 = vpack.c.bf16 %v692_v55, %v692_v55 }
 0x14c   :  { %2310 = vmatprep.subr.bf16.mxu0 %v2497_v24  ;;  %2332 = vmatprep.subr.bf16.mxu1 %v2498_v25  ;;  %v711_v24 = vpack.c.bf16 %v695_v20, %v695_v20 }
 0x14d   :  { %v713_v25 = vpack.c.bf16 %v697_v22, %v697_v22 }
 0x14f   :  { %2311 = vmatpush3.bf16.msra.mxu0 %v2499_v12  ;;  %2333 = vmatpush3.bf16.msra.mxu1 %v2500_v29  ;;  %v2543_v12 = vld [vmem:[#allocation8 + $0x310] sm:$0xff]  }
 0x150   :  { %2340 = vmatprep.subr.bf16.mxu0 %v2501_v42  ;;  %2362 = vmatprep.subr.bf16.mxu1 %v2502_v30  ;;  %v2544_v29 = vld [vmem:[#allocation8 + $0x390] sm:$0xff]   ;;  %v2545_v42 = vld [vmem:[#allocation8 + $0x358] sm:$0xff]  }
 0x151   :  { %v2546_v30 = vld [vmem:[#allocation8 + $0x3d8] sm:$0xff]  }
 0x152   :  { %1858 = vmatmul.mubr.bf16.vlgmr.msra.gmra.mrb[20].mxu0 %v702_v31  ;;  %1898 = vmatmul.mubr.bf16.vlgmr.msra.gmra.mrb[20].mxu1 %v704_v33  ;;  %v2548_v31 = vld [vmem:[#allocation8 + $0x398] sm:$0xff]   ;;  %v2550_v33 = vld [vmem:[#allocation8 + $0x3e0] sm:$0xff]  }
 0x153   :  { %2341 = vmatpush3.bf16.msra.mxu0 %v2503_v34  ;;  %2363 = vmatpush3.bf16.msra.mxu1 %v2504_v35  ;;  %v2551_v34 = vld [vmem:[#allocation8 + $0x320] sm:$0xff]  }
 0x154   :  { %2342 = vmatprep.subr.bf16.mxu0 %v2505_v36  ;;  %2364 = vmatprep.subr.bf16.mxu1 %v2506_v38  ;;  %v2552_v35 = vld [vmem:[#allocation8 + $0x3a0] sm:$0xff]   ;;  %v2553_v36 = vld [vmem:[#allocation8 + $0x368] sm:$0xff]  }
 0x155   :  { %1937 = vmatprep.mubr.bf16.mxu0 %v707_v44  ;;  %1977 = vmatprep.mubr.bf16.mxu1 %v709_v45  ;;  %v2554_v38 = vld [vmem:[#allocation8 + $0x3e8] sm:$0xff]  }
 0x156   :  { %v2555_v44 = vld [vmem:[#allocation8 + $0x328] sm:$0xff]  }
 0x157   :  { %2343 = vmatpush3.bf16.msra.mxu0 %v2507_v46  ;;  %2365 = vmatpush3.bf16.msra.mxu1 %v2508_v40  ;;  %v2556_v45 = vld [vmem:[#allocation8 + $0x3a8] sm:$0xff]   ;;  %v2557_v46 = vld [vmem:[#allocation8 + $0x370] sm:$0xff]  }
 0x158   :  { %2344 = vmatprep.subr.bf16.mxu0 %v2509_v48  ;;  %2366 = vmatprep.subr.bf16.mxu1 %v2510_v49  ;;  %v2558_v40 = vld [vmem:[#allocation8 + $0x3f0] sm:$0xff]  }
 0x159   :  { %v2559_v48 = vld [vmem:[#allocation8 + $0x330] sm:$0xff]  }
 0x15a   :  { %v2560_v49 = vld [vmem:[#allocation8 + $0x3b0] sm:$0xff]  }
 0x15b   :  { %2345 = vmatpush3.bf16.msra.mxu0 %v2511_v50  ;;  %2367 = vmatpush3.bf16.msra.mxu1 %v2512_v51  ;;  %v2561_v50 = vld [vmem:[#allocation8 + $0x378] sm:$0xff]  }
 0x15c   :  { %2346 = vmatprep.subr.bf16.mxu0 %v2513_v52  ;;  %2368 = vmatprep.subr.bf16.mxu1 %v2514_v53  ;;  %v2562_v51 = vld [vmem:[#allocation8 + $0x3f8] sm:$0xff]   ;;  %v696_v52 = vmax.f32 %v2849_v9, 0.0  ;;  %v2123_v9 = vld [vmem:[%s2892_s4] ss:$0 sm:$0xff]  ;;  %s2691_s4 = smov [#allocation10]  }
 0x15d   :  { %v2563_v53 = vld [vmem:[#allocation8 + $0x338] sm:$0xff]   ;;  %s2072_s17 = sshll.u32 %s2691_s4, 4  ;;  %s2073_s17 = int_to_ptr.vmem [resolvable:$true] %s2072_s17 }
 0x15e   :  { %s2653_s1 = scalar_lea.vmem %s2073_s17, 128  ;;  %p2658_p5 = scmp.lt.s32.totalorder %s2073_s17, %s2073_s17 }
 0x15f   :  { %2347 = vmatpush3.bf16.msra.mxu0 %v2515_v54  ;;  %2369 = vmatpush3.bf16.msra.mxu1 %v2516_v56  ;;  %v694_v54 = vmax.f32 %v2844_v3, 0.0  ;;  %v2564_v56 = vld [vmem:[#allocation8 + $0x3b8] sm:$0xff]   ;;  %p2654_p4 = scmp.ne.s32.totalorder %s2073_s17, %s2653_s1  ;;  %p2659_p6 = scmp.lt.s32.totalorder %s2653_s1, %s2653_s1 }
 0x160   :  { %2348 = vmatprep.subr.bf16.mxu0 %v2517_v57  ;;  %2370 = vmatprep.subr.bf16.mxu1 %v2518_v58  ;;  %v712_v57 = vpack.c.bf16 %v696_v52, %v696_v52 }
 0x161   :  { %v710_v58 = vpack.c.bf16 %v694_v54, %v694_v54  ;;  %p2660_p7 = por %p2659_p6, %p2658_p5 }
 0x163   :  { %2349 = vmatpush3.bf16.msra.mxu0 %v2519_v59  ;;  %2371 = vmatpush3.bf16.msra.mxu1 %v2520_v61  ;;  %p2661_p8 = pnand %p2660_p7, %p2654_p4 }
 0x164   :  { %2350 = vmatprep.subr.bf16.mxu0 %v2521_v62  ;;  %2372 = vmatprep.subr.bf16.mxu1 %v2522_v63 }
 0x167   :  { %2351 = vmatpush3.bf16.msra.mxu0 %v2523_v1  ;;  %2373 = vmatpush3.bf16.msra.mxu1 %v2524_v2 }
 0x168   :  { %2352 = vmatprep.subr.bf16.mxu0 %v2525_v5  ;;  %2374 = vmatprep.subr.bf16.mxu1 %v2526_v6 }
 0x16b   :  { %2353 = vmatpush3.bf16.msra.mxu0 %v2527_v11  ;;  %2375 = vmatpush3.bf16.msra.mxu1 %v2528_v0 }
 0x16c   :  { %2354 = vmatprep.subr.bf16.mxu0 %v2529_v14  ;;  %2376 = vmatprep.subr.bf16.mxu1 %v2530_v15 }
 0x16f   :  { %2355 = vmatpush3.bf16.msra.mxu0 %v2531_v37  ;;  %2377 = vmatpush3.bf16.msra.mxu1 %v2532_v60 }
 0x170   :  { %2384 = vmatprep.subr.bf16.mxu0 %v2533_v18  ;;  %2406 = vmatprep.subr.bf16.mxu1 %v2534_v39 }
 0x172   :  { %1938 = vmatmul.mubr.bf16.vlgmr.msra.gmra.mrb[24].mxu0 %v706_v21  ;;  %1978 = vmatmul.mubr.bf16.vlgmr.msra.gmra.mrb[24].mxu1 %v708_v23 }
 0x173   :  { %2385 = vmatpush3.bf16.msra.mxu0 %v2535_v4  ;;  %2407 = vmatpush3.bf16.msra.mxu1 %v2536_v43 }
 0x174   :  { %2386 = vmatprep.subr.bf16.mxu0 %v2537_v10  ;;  %2408 = vmatprep.subr.bf16.mxu1 %v2538_v47 }
 0x175   :  { %2017 = vmatprep.mubr.bf16.mxu0 %v711_v24  ;;  %2057 = vmatprep.mubr.bf16.mxu1 %v713_v25 }
 0x177   :  { %2387 = vmatpush3.bf16.msra.mxu0 %v2539_v26  ;;  %2409 = vmatpush3.bf16.msra.mxu1 %v2540_v27 }
 0x178   :  { %2388 = vmatprep.subr.bf16.mxu0 %v2541_v41  ;;  %2410 = vmatprep.subr.bf16.mxu1 %v2542_v28 }
 0x17b   :  { %2389 = vmatpush3.bf16.msra.mxu0 %v2543_v12  ;;  %2411 = vmatpush3.bf16.msra.mxu1 %v2544_v29 }
 0x17c   :  { %2390 = vmatprep.subr.bf16.mxu0 %v2545_v42  ;;  %2412 = vmatprep.subr.bf16.mxu1 %v2546_v30 }
 0x17f   :  { %2391 = vmatpush3.bf16.msra.mxu0 %v2547_v13  ;;  %2413 = vmatpush3.bf16.msra.mxu1 %v2548_v31 }
 0x180   :  { %2392 = vmatprep.subr.bf16.mxu0 %v2549_v32  ;;  %2414 = vmatprep.subr.bf16.mxu1 %v2550_v33 }
 0x183   :  { %2393 = vmatpush3.bf16.msra.mxu0 %v2551_v34  ;;  %2415 = vmatpush3.bf16.msra.mxu1 %v2552_v35 }
 0x184   :  { %2394 = vmatprep.subr.bf16.mxu0 %v2553_v36  ;;  %2416 = vmatprep.subr.bf16.mxu1 %v2554_v38 }
 0x187   :  { %2395 = vmatpush3.bf16.msra.mxu0 %v2555_v44  ;;  %2417 = vmatpush3.bf16.msra.mxu1 %v2556_v45 }
 0x188   :  { %2396 = vmatprep.subr.bf16.mxu0 %v2557_v46  ;;  %2418 = vmatprep.subr.bf16.mxu1 %v2558_v40 }
 0x18b   :  { %2397 = vmatpush3.bf16.msra.mxu0 %v2559_v48  ;;  %2419 = vmatpush3.bf16.msra.mxu1 %v2560_v49 }
 0x18c   :  { %2398 = vmatprep.subr.bf16.mxu0 %v2561_v50  ;;  %2420 = vmatprep.subr.bf16.mxu1 %v2562_v51 }
 0x18f   :  { %2399 = vmatpush3.bf16.msra.mxu0 %v2563_v53  ;;  %2421 = vmatpush3.bf16.msra.mxu1 %v2564_v56 }
 0x192   :  { %2018 = vmatmul.mubr.bf16.vlgmr.msra.gmra.mrb[28].mxu0 %v710_v58  ;;  %2058 = vmatmul.mubr.bf16.vlgmr.msra.gmra.mrb[28].mxu1 %v712_v57 }
 0x205   :  { %v2268_v59 = vpop.f32.mrb[16].mxu0  ;;  %v2290_v61 = vpop.f32.mrb[16].mxu1 }
 0x206   :  { %v2269_v62 = vpop.f32.mrb[17].mxu0  ;;  %v2291_v1 = vpop.f32.mrb[17].mxu1 }
 0x207   :  { %v2270_v63 = vadd.f32 %v2269_v62, %v2268_v59  ;;  %v2271_v3 = vpop.f32.mrb[18].mxu0  ;;  %v2292_v2 = vadd.f32 %v2291_v1, %v2290_v61  ;;  %v2293_v5 = vpop.f32.mrb[18].mxu1 }
 0x208   :  { %v2272_v6 = vpop.f32.mrb[19].mxu0  ;;  %v2294_v8 = vpop.f32.mrb[19].mxu1 }
 0x209   :  { %v1780_v7 = vadd.f32 %v2270_v63, %v2123_v9 }
 0x20b   :  { %v1820_v11 = vadd.f32 %v2292_v2, %v1780_v7 }
 0x225   :  { %v2312_v0 = vpop.f32.mrb[20].mxu0  ;;  %v2334_v14 = vpop.f32.mrb[20].mxu1 }
 0x226   :  { %v2313_v15 = vpop.f32.mrb[21].mxu0  ;;  %v2335_v17 = vpop.f32.mrb[21].mxu1 }
 0x227   :  { %v2314_v16 = vadd.f32 %v2313_v15, %v2312_v0  ;;  %v2315_v19 = vpop.f32.mrb[22].mxu0  ;;  %v2336_v55 = vadd.f32 %v2335_v17, %v2334_v14  ;;  %v2337_v37 = vpop.f32.mrb[22].mxu1 }
 0x228   :  { %v2316_v60 = vpop.f32.mrb[23].mxu0  ;;  %v2338_v39 = vpop.f32.mrb[23].mxu1 }
 0x229   :  { %v1860_v18 = vadd.f32 %v2314_v16, %v1820_v11 }
 0x22b   :  { %v1900_v20 = vadd.f32 %v2336_v55, %v1860_v18 }
 0x245   :  { %v2356_v21 = vpop.f32.mrb[24].mxu0  ;;  %v2378_v22 = vpop.f32.mrb[24].mxu1 }
 0x246   :  { %v2357_v23 = vpop.f32.mrb[25].mxu0  ;;  %v2379_v43 = vpop.f32.mrb[25].mxu1 }
 0x247   :  { %v2358_v4 = vadd.f32 %v2357_v23, %v2356_v21  ;;  %v2359_v10 = vpop.f32.mrb[26].mxu0  ;;  %v2380_v47 = vadd.f32 %v2379_v43, %v2378_v22  ;;  %v2381_v24 = vpop.f32.mrb[26].mxu1 }
 0x248   :  { %v2360_v25 = vpop.f32.mrb[27].mxu0  ;;  %v2382_v27 = vpop.f32.mrb[27].mxu1 }
 0x249   :  { %v1940_v26 = vadd.f32 %v2358_v4, %v1900_v20 }
 0x24b   :  { %v1980_v41 = vadd.f32 %v2380_v47, %v1940_v26 }
 0x265   :  { %v2400_v28 = vpop.f32.mrb[28].mxu0  ;;  %v2422_v12 = vpop.f32.mrb[28].mxu1 }
 0x266   :  { %v2401_v29 = vpop.f32.mrb[29].mxu0  ;;  %v2423_v30 = vpop.f32.mrb[29].mxu1 }
 0x267   :  { %v2402_v42 = vadd.f32 %v2401_v29, %v2400_v28  ;;  %v2403_v13 = vpop.f32.mrb[30].mxu0  ;;  %v2424_v31 = vadd.f32 %v2423_v30, %v2422_v12  ;;  %v2425_v32 = vpop.f32.mrb[30].mxu1 }
 0x268   :  { %v2404_v33 = vpop.f32.mrb[31].mxu0  ;;  %v2426_v35 = vpop.f32.mrb[31].mxu1 }
 0x269   :  { %v2020_v34 = vadd.f32 %v2402_v42, %v1980_v41 }
 0x26b   :  { %v2060_v36 = vadd.f32 %v2424_v31, %v2020_v34 }
 0x26d   :  { %2065 = vst [vmem:[#allocation10] sm:$0xff] %v2060_v36 }
 0x26e   :  { %2664 = shalt.err (!%p2661_p8)
}
 0x26f   :  { %s2665_s20 = scalar_lea.hbm %s2893_s5, 128 }
 0x270   :  { %p2666_p9 = scmp.ne.s32.totalorder %s2893_s5, %s2665_s20  ;;  %p2669_p10 = scmp.lt.u32.totalorder %s2665_s20, %s2893_s5 }
 0x272   :  { %p2671_p11 = pnand %p2669_p10, %p2666_p9 }
 0x274   :  { %2674 = shalt.err (!%p2671_p11)
}
 0x275   :  { %2075 = dma.vmem_to_hbm [thread:$0]  %s2073_s17, 128, %s2893_s5, [#allocation4]  }
 0x276   :  { %2681 = dma.done.wait [#allocation4], 128  }
 0x277   :  { %2682 = vsyncadd [#allocation4], 4294967168 }
 0x278   :  { %2079 = vsyncpa [#allocation3], 1 }
 0x279   :  { %2080 = vsyncpa [#allocation6], 1 }
 0x27a   :  { %2081 = vsyncpa [#allocation9], 1 }
 0x27b   :  { %2082 = vsyncpa [#allocation4], 1 }

</bundles_post_ra>
